<compile_context>
chip_gen: v7x
topology: tpu7x:2x2x1
jax: 0.10.0
libtpu: 0.0.40
codegen_flags: <defaults>
</compile_context>

<pallas_src>
import functools
import math

import jax
import jax.numpy as jnp
from jax.experimental import pallas as pl
from jax.experimental.pallas import tpu as pltpu

SQRT2 = math.sqrt(2.0)
_LANE = 128


def _scaled_leaky_relu_kernel(x_ref, o_ref, *, negative_slope):
    x = x_ref[...]
    y = jnp.where(x >= 0, x, negative_slope * x) * SQRT2
    o_ref[...] = y.astype(o_ref.dtype)


def scaled_leaky_relu(x, negative_slope=0.2, *, tile_rows=512, tile_cols=8 * _LANE):
    """ScaledLeakyReLU: leaky_relu(x, negative_slope) * sqrt(2). Any shape."""
    orig_shape = x.shape
    orig_dtype = x.dtype
    n = x.size
    if n == 0:
        return x

    # Flatten into a lane-dense 2-D slab: (rows_p, tile_cols), tile_cols % 128 == 0.
    rows = pl.cdiv(n, tile_cols)
    # Row-tile size: multiple of 8 (sublanes), capped so tiny inputs are a
    # single full-array block (full-array blocks are exempt from (8,128)).
    tr = min(tile_rows, max(8, pl.cdiv(rows, 8) * 8))
    rows_p = pl.cdiv(rows, tr) * tr
    total = rows_p * tile_cols

    flat = x.reshape(-1)
    if total != n:
        flat = jnp.pad(flat, (0, total - n))
    x2 = flat.reshape(rows_p, tile_cols)

    # VMEM budget from actual footprint: (in + out) x double buffering, plus
    # headroom -- never the physical maximum.
    tile_bytes = tr * tile_cols * jnp.dtype(orig_dtype).itemsize
    vmem_limit = int(min(max(8 * tile_bytes, 16 << 20), 48 << 20))

    kern = functools.partial(
        _scaled_leaky_relu_kernel, negative_slope=float(negative_slope)
    )
    out = pl.pallas_call(
        kern,
        out_shape=jax.ShapeDtypeStruct((rows_p, tile_cols), orig_dtype),
        grid=(rows_p // tr,),
        in_specs=[pl.BlockSpec((tr, tile_cols), lambda i: (i, 0))],
        out_specs=pl.BlockSpec((tr, tile_cols), lambda i: (i, 0)),
        compiler_params=pltpu.CompilerParams(
            dimension_semantics=("parallel",),
            vmem_limit_bytes=vmem_limit,
        ),
    )(x2)

    return out.reshape(-1)[:n].reshape(orig_shape)


def _reference(x, negative_slope=0.2):
    return jnp.where(x >= 0, x, negative_slope * x) * SQRT2


if __name__ == "__main__":
    key = jax.random.PRNGKey(0)
    # Small NCHW-style input consistent with how the module is used.
    x = jax.random.normal(key, (2, 4, 16, 16), jnp.float32)

    run = jax.jit(scaled_leaky_relu)
    out = jax.block_until_ready(run(x))

    assert out.shape == x.shape and out.dtype == x.dtype
    assert jnp.allclose(out, _reference(x), atol=1e-6, rtol=1e-6), \
        "mismatch vs reference"

    # Exercise a larger, non-tile-aligned shape to hit the multi-tile path.
    x2 = jax.random.normal(jax.random.PRNGKey(1), (3, 7, 33, 65), jnp.float32)
    out2 = jax.block_until_ready(run(x2))
    assert jnp.allclose(out2, _reference(x2), atol=1e-6, rtol=1e-6), \
        "mismatch vs reference (large shape)"

    print("KERNEL_OK")
</pallas_src>

<mosaic_0001>
module attributes {stable_mosaic.version = 11 : i64} {
  func.func @_scaled_leaky_relu_kernel(%arg0: i32, %arg1: memref<8x1024xf32, #tpu.memory_space<vmem>>, %arg2: memref<8x1024xf32, #tpu.memory_space<vmem>>) attributes {dimension_semantics = [#tpu.dimension_semantics<parallel>], iteration_bounds = array<i64: 1>, scalar_prefetch = 0 : i64, scratch_operands = 0 : i64, tpu.core_type = #tpu.core_type<tc>, window_params = [{transform_indices = @transform_0, window_bounds = array<i64: 8, 1024>}, {transform_indices = @transform_1, window_bounds = array<i64: 8, 1024>}]} {
    %c0 = arith.constant 0 : index
    %c0_0 = arith.constant 0 : index
    %0 = vector.load %arg1[%c0, %c0_0] : memref<8x1024xf32, #tpu.memory_space<vmem>>, vector<8x1024xf32>
    %cst = arith.constant 0.000000e+00 : f32
    %1 = vector.broadcast %cst : f32 to vector<8x1024xf32>
    %2 = arith.cmpf oge, %0, %1 : vector<8x1024xf32>
    %cst_1 = arith.constant 2.000000e-01 : f32
    %3 = vector.broadcast %cst_1 : f32 to vector<8x1024xf32>
    %4 = arith.mulf %3, %0 : vector<8x1024xf32>
    %5 = arith.select %2, %0, %4 : vector<8x1024xi1>, vector<8x1024xf32>
    %cst_2 = arith.constant 1.41421354 : f32
    %6 = vector.broadcast %cst_2 : f32 to vector<8x1024xf32>
    %7 = arith.mulf %5, %6 : vector<8x1024xf32>
    %c0_3 = arith.constant 0 : index
    %c0_4 = arith.constant 0 : index
    %8 = vector.load %arg2[%c0_3, %c0_4] : memref<8x1024xf32, #tpu.memory_space<vmem>>, vector<8x1024xf32>
    tpu.vector_store %arg2[%c0_3, %c0_4], %7 {strides = array<i32>} : memref<8x1024xf32, #tpu.memory_space<vmem>>, vector<8x1024xf32>,
    return
  }
  func.func @transform_0(%arg0: i32) -> (i32, i32) {
    %c0_i32 = arith.constant 0 : i32
    %c0_i32_0 = arith.constant 0 : i32
    return %arg0, %c0_i32 : i32, i32
  }
  func.func @transform_1(%arg0: i32) -> (i32, i32) {
    %c0_i32 = arith.constant 0 : i32
    %c0_i32_0 = arith.constant 0 : i32
    return %arg0, %c0_i32 : i32, i32
  }
}

</mosaic_0001>

<bundles_post_ra>
// kernel: scaled_leaky_relu.1
= control target key start
LH: loop header
LB: loop body
LE: loop exit
PB: predicated region body
PF: predicated region fallthrough
CT: control target
= control target key end

     0   :  { %s118_s0 = inlined_call_operand.vmem [shape: f32[8,1024], index: 0, kind: input, shape index: {}]   ;;  %s119_s1 = inlined_call_operand.vmem [shape: f32[8,1024], index: 1, kind: output, shape index: {}]  }
   0x1   :  { %v8_v0 = vld [vmem:[%s118_s0] sm:$0xff]  ;;  %v9_v1 = vld [vmem:[%s118_s0 + $0x8] sm:$0xff]  ;;  %v10_v2 = vld [vmem:[%s118_s0 + $0x10] sm:$0xff] }
   0x2   :  { %vm16_vm0 = vcmp.ge.f32.partialorder %v8_v0, 0.0  ;;  %v24_v3 = vmul.f32 0.2, %v8_v0  ;;  %vm17_vm1 = vcmp.ge.f32.partialorder %v9_v1, 0.0  ;;  %v25_v4 = vmul.f32 0.2, %v9_v1 }
   0x3   :  { %vm18_vm2 = vcmp.ge.f32.partialorder %v10_v2, 0.0  ;;  %v26_v5 = vmul.f32 0.2, %v10_v2  ;;  %v11_v6 = vld [vmem:[%s118_s0 + $0x18] sm:$0xff]  ;;  %v12_v7 = vld [vmem:[%s118_s0 + $0x20] sm:$0xff]  ;;  %v13_v8 = vld [vmem:[%s118_s0 + $0x28] sm:$0xff] }
   0x4   :  { %v32_v9 = vsel %vm16_vm0, %v8_v0, %v24_v3  ;;  %v33_v10 = vsel %vm17_vm1, %v9_v1, %v25_v4  ;;  %vm19_vm3 = vcmp.ge.f32.partialorder %v11_v6, 0.0  ;;  %v27_v11 = vmul.f32 0.2, %v11_v6  ;;  %v14_v12 = vld [vmem:[%s118_s0 + $0x30] sm:$0xff]  ;;  %v15_v13 = vld [vmem:[%s118_s0 + $0x38] sm:$0xff] }
   0x5   :  { %v40_v14 = vmul.f32 1.4142135, %v32_v9  ;;  %v41_v15 = vmul.f32 1.4142135, %v33_v10  ;;  %v34_v16 = vsel %vm18_vm2, %v10_v2, %v26_v5  ;;  %vm20_vm4 = vcmp.ge.f32.partialorder %v12_v7, 0.0 }
   0x6   :  { %v42_v17 = vmul.f32 1.4142135, %v34_v16  ;;  %v35_v18 = vsel %vm19_vm3, %v11_v6, %v27_v11  ;;  %v28_v19 = vmul.f32 0.2, %v12_v7  ;;  %vm21_vm5 = vcmp.ge.f32.partialorder %v13_v8, 0.0 }
   0x7   :  { %48 = vst [vmem:[%s119_s1] sm:$0xff] %v40_v14  ;;  %49 = vst [vmem:[%s119_s1 + $0x8] sm:$0xff] %v41_v15  ;;  %v43_v20 = vmul.f32 1.4142135, %v35_v18  ;;  %v29_v21 = vmul.f32 0.2, %v13_v8  ;;  %vm22_vm6 = vcmp.ge.f32.partialorder %v14_v12, 0.0 }
   0x8   :  { %vm23_vm7 = vcmp.ge.f32.partialorder %v15_v13, 0.0  ;;  %50 = vst [vmem:[%s119_s1 + $0x10] sm:$0xff] %v42_v17  ;;  %v36_v22 = vsel %vm20_vm4, %v12_v7, %v28_v19  ;;  %v30_v23 = vmul.f32 0.2, %v14_v12  ;;  %v31_v24 = vmul.f32 0.2, %v15_v13 }
   0x9   :  { %51 = vst [vmem:[%s119_s1 + $0x18] sm:$0xff] %v43_v20  ;;  %v44_v25 = vmul.f32 1.4142135, %v36_v22  ;;  %v37_v26 = vsel %vm21_vm5, %v13_v8, %v29_v21 }
   0xa   :  { %v45_v27 = vmul.f32 1.4142135, %v37_v26  ;;  %v38_v28 = vsel %vm22_vm6, %v14_v12, %v30_v23  ;;  %v39_v29 = vsel %vm23_vm7, %v15_v13, %v31_v24 }
   0xb   :  { %52 = vst [vmem:[%s119_s1 + $0x20] sm:$0xff] %v44_v25  ;;  %v46_v30 = vmul.f32 1.4142135, %v38_v28  ;;  %v47_v31 = vmul.f32 1.4142135, %v39_v29 }
   0xc   :  { %53 = vst [vmem:[%s119_s1 + $0x28] sm:$0xff] %v45_v27 }
   0xd   :  { %54 = vst [vmem:[%s119_s1 + $0x30] sm:$0xff] %v46_v30  ;;  %55 = vst [vmem:[%s119_s1 + $0x38] sm:$0xff] %v47_v31 }

</bundles_post_ra>
